<compile_context>
chip_gen: v5e
topology: v5e:2x2
jax: 0.10.0
libtpu: 0.0.40
codegen_flags: <defaults>
</compile_context>

<pallas_src>
import functools

import jax
import jax.numpy as jnp
from jax.experimental import pallas as pl
from jax.experimental.pallas import tpu as pltpu


def _pick_spatial_tile(hw: int, target: int = 512) -> int:
    """Pick the lane-axis tile size for the flattened output-spatial dimension.

    - If the whole spatial extent fits in one target-sized tile, take it whole (a block equal
      to the full array dim is always legal, even if not a multiple of 128).
    - Otherwise prefer the largest multiple of 128 <= target that divides hw exactly (no ragged
      tail); if none divides, use `target` and let Pallas mask the final partial tile.
    """
    if hw <= target:
        return hw
    t = target
    while t >= 128:
        if hw % t == 0:
            return t
        t -= 128
    return target


def _stem_kernel(x_ref, w_ref, b_ref, g_ref, beta_ref, o_ref, *, eps):
    # x_ref:    (K, TM)    patches^T column tile for one image
    # w_ref:    (Cout, K)  flattened conv weight (resident block)
    # b_ref/g_ref/beta_ref: (Cout, 1) conv bias / LN gamma / LN beta (resident, f32)
    # o_ref:    (Cout, TM) output tile, lane-dense and already in NCHW order
    y = jnp.dot(w_ref[...], x_ref[...], preferred_element_type=jnp.float32)   # MXU, f32 acc
    y = y + b_ref[...]                                                        # (Cout, TM)

    # channels_first LayerNorm over Cout (sublane axis), single-pass stats.
    inv_c = 1.0 / y.shape[0]
    u = jnp.sum(y, axis=0, keepdims=True) * inv_c                             # (1, TM)
    s = jnp.sum(y * y, axis=0, keepdims=True) * inv_c - u * u                 # biased variance
    s = jnp.maximum(s, 0.0)              # E[y^2]-E[y]^2 can dip < 0 in f32 -> guard rsqrt
    inv = jax.lax.rsqrt(s + eps)                                              # (1, TM) -> EUP

    gs = g_ref[...] * inv                                                     # (Cout, TM)
    # NOTE: in a ragged final tile the out-of-range lanes hold unspecified values; they are
    # never stored (Pallas masks the partial output block), and each column is independent.
    o_ref[...] = ((y - u) * gs + beta_ref[...]).astype(o_ref.dtype)


def convnext_stem(x_nchw, conv_w, conv_b, ln_w, ln_b, *, patch_size, eps=1e-6,
                  spatial_tile=512):
    """x_nchw: (B, Cin, H, W); conv_w: (Cout, Cin, p, p); conv_b/ln_w/ln_b: (Cout,).
    Returns (B, Cout, H//p, W//p), matching the PyTorch ConvNeXtStem forward."""
    B, Cin, H, W = x_nchw.shape
    Cout = conv_w.shape[0]
    p = patch_size
    assert H % p == 0 and W % p == 0, "spatial dims must be divisible by patch_size"
    Hp, Wp = H // p, W // p
    K = Cin * p * p
    hw = Hp * Wp

    # im2col (see module-level TODO): patches^T, K flattened in Conv2d (Cin, kh, kw) order.
    patches_t = (
        x_nchw.reshape(B, Cin, Hp, p, Wp, p)
        .transpose(0, 1, 3, 5, 2, 4)          # (B, Cin, p, p, Hp, Wp)
        .reshape(B, K, hw)
    )

    tm = _pick_spatial_tile(hw, spatial_tile)
    n_tiles = pl.cdiv(hw, tm)

    # Weights follow the activation dtype (bf16 x -> bf16 MXU path); LN math stays f32.
    w_flat = conv_w.reshape(Cout, K).astype(x_nchw.dtype)
    b2 = conv_b.reshape(Cout, 1).astype(jnp.float32)
    g2 = ln_w.reshape(Cout, 1).astype(jnp.float32)
    be2 = ln_b.reshape(Cout, 1).astype(jnp.float32)

    itemsize = jnp.dtype(x_nchw.dtype).itemsize

    out = pl.pallas_call(
        functools.partial(_stem_kernel, eps=eps),
        out_shape=jax.ShapeDtypeStruct((B, Cout, hw), x_nchw.dtype),
        grid_spec=pltpu.PrefetchScalarGridSpec(
            num_scalar_prefetch=0,
            grid=(B, n_tiles),
            in_specs=[
                pl.BlockSpec((None, K, tm), lambda b, j: (b, 0, j)),   # patches^T tile
                pl.BlockSpec((Cout, K), lambda b, j: (0, 0)),          # conv weight (resident)
                pl.BlockSpec((Cout, 1), lambda b, j: (0, 0)),          # conv bias
                pl.BlockSpec((Cout, 1), lambda b, j: (0, 0)),          # LN gamma
                pl.BlockSpec((Cout, 1), lambda b, j: (0, 0)),          # LN beta
            ],
            out_specs=pl.BlockSpec((None, Cout, tm), lambda b, j: (b, 0, j)),
        ),
        compiler_params=pltpu.CompilerParams(
            dimension_semantics=("parallel", "parallel"),
            vmem_limit_bytes=32 * 1024 * 1024,   # explicit, fits v7x's 64 MiB with headroom
        ),
        cost_estimate=pl.CostEstimate(
            flops=int(2 * B * hw * K * Cout + 8 * B * hw * Cout),
            transcendentals=int(B * hw),
            bytes_accessed=int(B * K * hw * itemsize
                               + Cout * K * itemsize
                               + B * Cout * hw * itemsize),
        ),
    )(patches_t, w_flat, b2, g2, be2)

    # Already in NCHW order and unpadded: this reshape is metadata-only (free).
    return out.reshape(B, Cout, Hp, Wp)


def _reference(x_nchw, conv_w, conv_b, ln_w, ln_b, *, patch_size, eps=1e-6):
    # pure-JAX reference of the PyTorch forward, for a sanity check
    y = jax.lax.conv_general_dilated(
        x_nchw, conv_w,
        window_strides=(patch_size, patch_size),
        padding="VALID",
        dimension_numbers=("NCHW", "OIHW", "NCHW"),
    ) + conv_b[None, :, None, None]
    u = jnp.mean(y, axis=1, keepdims=True)
    s = jnp.mean((y - u) ** 2, axis=1, keepdims=True)
    y = (y - u) / jnp.sqrt(s + eps)
    return ln_w[None, :, None, None] * y + ln_b[None, :, None, None]


if __name__ == "__main__":
    # small shapes consistent with the module (in_chans=3 default, modest out_chans)
    B, Cin, H, W = 2, 3, 16, 16
    patch_size = 4
    Cout = 32

    key = jax.random.PRNGKey(0)
    k_x, k_w, k_b = jax.random.split(key, 3)

    x = jax.random.normal(k_x, (B, Cin, H, W), dtype=jnp.float32)
    conv_w = 0.1 * jax.random.normal(k_w, (Cout, Cin, patch_size, patch_size), jnp.float32)
    conv_b = 0.05 * jax.random.normal(k_b, (Cout,), jnp.float32)
    ln_w = jnp.ones((Cout,), jnp.float32)       # MetaAILayerNorm init: weight=1
    ln_b = jnp.zeros((Cout,), jnp.float32)      # MetaAILayerNorm init: bias=0

    out = convnext_stem(x, conv_w, conv_b, ln_w, ln_b, patch_size=patch_size)
    out = jax.block_until_ready(out)

    ref = _reference(x, conv_w, conv_b, ln_w, ln_b, patch_size=patch_size)
    assert out.shape == (B, Cout, H // patch_size, W // patch_size)
    assert jnp.allclose(out, ref, atol=1e-4, rtol=1e-4)

    print("KERNEL_OK")
</pallas_src>

<mosaic_0001>
module attributes {stable_mosaic.version = 11 : i64} {
  func.func @_stem_kernel(%arg0: i32, %arg1: i32, %arg2: memref<1x48x16xf32, #tpu.memory_space<vmem>>, %arg3: memref<32x48xf32, #tpu.memory_space<vmem>>, %arg4: memref<32x1xf32, #tpu.memory_space<vmem>>, %arg5: memref<32x1xf32, #tpu.memory_space<vmem>>, %arg6: memref<32x1xf32, #tpu.memory_space<vmem>>, %arg7: memref<1x32x16xf32, #tpu.memory_space<vmem>>) attributes {dimension_semantics = [#tpu.dimension_semantics<parallel>, #tpu.dimension_semantics<parallel>], iteration_bounds = array<i64: 2, 1>, scalar_prefetch = 0 : i64, scratch_operands = 0 : i64, tpu.core_type = #tpu.core_type<tc>, window_params = [{transform_indices = @transform_0, window_bounds = array<i64: 1, 48, 16>}, {pipeline_mode = #tpu.pipeline_mode<synchronous>, transform_indices = @transform_1, window_bounds = array<i64: 32, 48>}, {pipeline_mode = #tpu.pipeline_mode<synchronous>, transform_indices = @transform_2, window_bounds = array<i64: 32, 1>}, {pipeline_mode = #tpu.pipeline_mode<synchronous>, transform_indices = @transform_3, window_bounds = array<i64: 32, 1>}, {pipeline_mode = #tpu.pipeline_mode<synchronous>, transform_indices = @transform_4, window_bounds = array<i64: 32, 1>}, {transform_indices = @transform_5, window_bounds = array<i64: 1, 32, 16>}]} {
    %c0 = arith.constant 0 : index
    %c0_0 = arith.constant 0 : index
    %0 = vector.load %arg3[%c0, %c0_0] : memref<32x48xf32, #tpu.memory_space<vmem>>, vector<32x48xf32>
    %c0_1 = arith.constant 0 : index
    %c0_2 = arith.constant 0 : index
    %c0_3 = arith.constant 0 : index
    %1 = vector.load %arg2[%c0_1, %c0_2, %c0_3] : memref<1x48x16xf32, #tpu.memory_space<vmem>>, vector<1x48x16xf32>
    %2 = vector.shape_cast %1 : vector<1x48x16xf32> to vector<48x16xf32>
    %cst = arith.constant dense<0.000000e+00> : vector<32x16xf32>
    %3 = tpu.matmul %0, %2, %cst {dimension_numbers = #tpu.dot_dimension_numbers<[1], [0], [0], [1], [0, 0, 1, 1], [], []>} : vector<32x48xf32>, vector<48x16xf32>, vector<32x16xf32> -> vector<32x16xf32>
    %c0_4 = arith.constant 0 : index
    %c0_5 = arith.constant 0 : index
    %4 = vector.load %arg4[%c0_4, %c0_5] : memref<32x1xf32, #tpu.memory_space<vmem>>, vector<32x1xf32>
    %5 = vector.broadcast %4 : vector<32x1xf32> to vector<32x16xf32>
    %6 = arith.addf %3, %5 : vector<32x16xf32>
    %cst_6 = arith.constant dense<0.000000e+00> : vector<16xf32>
    %7 = vector.multi_reduction <add>, %6, %cst_6 [0] : vector<32x16xf32> to vector<16xf32>
    %8 = vector.shape_cast %7 : vector<16xf32> to vector<1x16xf32>
    %cst_7 = arith.constant 3.125000e-02 : f32
    %9 = vector.broadcast %cst_7 : f32 to vector<1x16xf32>
    %10 = arith.mulf %8, %9 : vector<1x16xf32>
    %11 = arith.mulf %6, %6 : vector<32x16xf32>
    %cst_8 = arith.constant dense<0.000000e+00> : vector<16xf32>
    %12 = vector.multi_reduction <add>, %11, %cst_8 [0] : vector<32x16xf32> to vector<16xf32>
    %13 = vector.shape_cast %12 : vector<16xf32> to vector<1x16xf32>
    %cst_9 = arith.constant 3.125000e-02 : f32
    %14 = vector.broadcast %cst_9 : f32 to vector<1x16xf32>
    %15 = arith.mulf %13, %14 : vector<1x16xf32>
    %16 = arith.mulf %10, %10 : vector<1x16xf32>
    %17 = arith.subf %15, %16 : vector<1x16xf32>
    %cst_10 = arith.constant 0.000000e+00 : f32
    %18 = vector.broadcast %cst_10 : f32 to vector<1x16xf32>
    %19 = arith.maximumf %17, %18 : vector<1x16xf32>
    %cst_11 = arith.constant 9.99999997E-7 : f32
    %20 = vector.broadcast %cst_11 : f32 to vector<1x16xf32>
    %21 = arith.addf %19, %20 : vector<1x16xf32>
    %22 = math.rsqrt %21 : vector<1x16xf32>
    %c0_12 = arith.constant 0 : index
    %c0_13 = arith.constant 0 : index
    %23 = vector.load %arg5[%c0_12, %c0_13] : memref<32x1xf32, #tpu.memory_space<vmem>>, vector<32x1xf32>
    %24 = vector.broadcast %23 : vector<32x1xf32> to vector<32x16xf32>
    %25 = vector.broadcast %22 : vector<1x16xf32> to vector<32x16xf32>
    %26 = arith.mulf %24, %25 : vector<32x16xf32>
    %27 = vector.broadcast %10 : vector<1x16xf32> to vector<32x16xf32>
    %28 = arith.subf %6, %27 : vector<32x16xf32>
    %29 = arith.mulf %28, %26 : vector<32x16xf32>
    %c0_14 = arith.constant 0 : index
    %c0_15 = arith.constant 0 : index
    %30 = vector.load %arg6[%c0_14, %c0_15] : memref<32x1xf32, #tpu.memory_space<vmem>>, vector<32x1xf32>
    %31 = vector.broadcast %30 : vector<32x1xf32> to vector<32x16xf32>
    %32 = arith.addf %29, %31 : vector<32x16xf32>
    %c0_16 = arith.constant 0 : index
    %c0_17 = arith.constant 0 : index
    %c0_18 = arith.constant 0 : index
    %33 = vector.load %arg7[%c0_16, %c0_17, %c0_18] : memref<1x32x16xf32, #tpu.memory_space<vmem>>, vector<1x32x16xf32>
    %34 = vector.shape_cast %33 : vector<1x32x16xf32> to vector<32x16xf32>
    %35 = vector.shape_cast %32 : vector<32x16xf32> to vector<1x32x16xf32>
    tpu.vector_store %arg7[%c0_16, %c0_17, %c0_18], %35 {strides = array<i32>} : memref<1x32x16xf32, #tpu.memory_space<vmem>>, vector<1x32x16xf32>,
    return
  }
  func.func @transform_0(%arg0: i32, %arg1: i32) -> (i32, i32, i32) {
    %c0_i32 = arith.constant 0 : i32
    %c0_i32_0 = arith.constant 0 : i32
    return %arg0, %c0_i32, %arg1 : i32, i32, i32
  }
  func.func @transform_1(%arg0: i32, %arg1: i32) -> (i32, i32) {
    %c0_i32 = arith.constant 0 : i32
    %c0_i32_0 = arith.constant 0 : i32
    %c0_i32_1 = arith.constant 0 : i32
    return %c0_i32, %c0_i32_0 : i32, i32
  }
  func.func @transform_2(%arg0: i32, %arg1: i32) -> (i32, i32) {
    %c0_i32 = arith.constant 0 : i32
    %c0_i32_0 = arith.constant 0 : i32
    %c0_i32_1 = arith.constant 0 : i32
    return %c0_i32, %c0_i32_0 : i32, i32
  }
  func.func @transform_3(%arg0: i32, %arg1: i32) -> (i32, i32) {
    %c0_i32 = arith.constant 0 : i32
    %c0_i32_0 = arith.constant 0 : i32
    %c0_i32_1 = arith.constant 0 : i32
    return %c0_i32, %c0_i32_0 : i32, i32
  }
  func.func @transform_4(%arg0: i32, %arg1: i32) -> (i32, i32) {
    %c0_i32 = arith.constant 0 : i32
    %c0_i32_0 = arith.constant 0 : i32
    %c0_i32_1 = arith.constant 0 : i32
    return %c0_i32, %c0_i32_0 : i32, i32
  }
  func.func @transform_5(%arg0: i32, %arg1: i32) -> (i32, i32, i32) {
    %c0_i32 = arith.constant 0 : i32
    %c0_i32_0 = arith.constant 0 : i32
    return %arg0, %c0_i32, %arg1 : i32, i32, i32
  }
}

</mosaic_0001>

<bundles_post_ra>
// kernel: tpu_custom_call.1
= control target key start
LH: loop header
LB: loop body
LE: loop exit
PB: predicated region body
PF: predicated region fallthrough
CT: control target
= control target key end

     0   :  { %s649_s18 = smov 0   ;;  %s651_s19 = smov 0   ;;  %s758_s0 = inlined_call_operand.vmem [shape: f32[2,48,16], index: 0, kind: input, shape index: {}]   ;;  %s759_s1 = inlined_call_operand.vmem [shape: f32[32,48], index: 1, kind: input, shape index: {}]   ;;  %s760_s2 = inlined_call_operand.vmem [shape: f32[32,1], index: 2, kind: input, shape index: {}]   ;;  %s761_s3 = inlined_call_operand.vmem [shape: f32[32,1], index: 3, kind: input, shape index: {}]   ;;  %s762_s4 = inlined_call_operand.vmem [shape: f32[32,1], index: 4, kind: input, shape index: {}]   ;;  %s763_s5 = inlined_call_operand.vmem [shape: f32[2,32,16], index: 5, kind: output, shape index: {}]  }
   0x1   :  { %s653_s20 = smov 0  }
   0x2 LB: > { %s27_s21 = sadd.s32 1, %s612_s19  ;;  %p534_p0 = scmp.ge.s32.totalorder %s616_s20, 1  ;;  %s616_s20 = sphi %s653_s20, %s15_s20   ;;  %s612_s19 = sphi %s651_s19, %s765_s19   ;;  %s608_s18 = sphi %s649_s18, %s764_s18  }
   0x3   : > { %p29_p1 = scmp.ge.s32.totalorder %s27_s21, 2  ;;  %p206_p2 = scmp.lt.s32.totalorder %s616_s20, 3 }
   0x5   : > { %s767_s21 = smov (%p29_p1, %s27_s21), 0  ;;  %p207_p3 = pnand %p534_p0, %p206_p2 }
   0x6   : > { %p240_p4 = scmp.lt.s32.totalorder (!%p207_p3), %s608_s18, 1 }
   0x7   : > { %210 = sbr.rel (%p207_p3) target bundleno = 220 (0xdc), region = 40 }
   0xc   : > { %v266_v0 = vld [vmem:[%s760_s2] sm:$0xff]  ;;  %v268_v1 = vld [vmem:[%s760_s2 + $0x10] sm:$0xff]  ;;  %v618_v2 = vmov 0   ;;  %s769_s18 = smov (!%p240_p4, %s608_s18), 1  ;;  %v267_v5 = vld [vmem:[%s760_s2 + $0x8] sm:$0xff]  ;;  %vm290_vm0 = vcmask 392192  }
   0xd   : > { %589 = vset.pattern.permute.xlu0 %v618_v2  ;;  %590 = vset.pattern.permute.xlu1 %v618_v2  ;;  %s563_s26 = smul.u32 48, %s769_s18  ;;  %v379_v3 = vld [vmem:[%s761_s3] sm:$0xff]  ;;  %v269_v8 = vld [vmem:[%s760_s2 + $0x18] sm:$0xff]  ;;  %v381_v11 = vld [vmem:[%s761_s3 + $0x10] sm:$0xff]  ;;  %vm332_vm1 = vcmask 130048   ;;  %s544_s12 = sshll.u32 %s769_s18, 5 }
   0xe   : > { %272 = vperm.xlu0 %589, %v266_v0   ;;  %282 = vperm.xlu1 %590, %v268_v1   ;;  %v256_v13 = vld [vmem:[%s759_s1] sm:$0xff]  ;;  %v257_v14 = vld [vmem:[%s759_s1 + $0x8] sm:$0xff]  ;;  %v258_v15 = vld [vmem:[%s759_s1 + $0x10] sm:$0xff]  ;;  %s255_s15 = scalar_lea.vmem %s763_s5, %s544_s12 }
   0xf   : > { %591 = vset.pattern.permute.xlu2 %v618_v2  ;;  %s247_s6 = scalar_lea.vmem %s758_s0, %s563_s26  ;;  %v259_v16 = vld [vmem:[%s759_s1 + $0x18] sm:$0xff]  ;;  %v380_v18 = vld [vmem:[%s761_s3 + $0x8] sm:$0xff]  ;;  %v417_v20 = vld [vmem:[%s762_s4 + $0x10] sm:$0xff] }
  0x10   : > { %385 = vperm.xlu2 %591, %v379_v3   ;;  %v265_v4 = vld [vmem:[%s247_s6 + $0x28] sm:$0xff]  ;;  %v264_v6 = vld [vmem:[%s247_s6 + $0x20] sm:$0xff]  ;;  %v263_v7 = vld [vmem:[%s247_s6 + $0x18] sm:$0xff] }
  0x11   : > { %313 = vmatpush.msra.mxu0 %v265_v4  ;;  %545 = vmatpush.msra.mxu1 %v265_v4  ;;  %v262_v9 = vld [vmem:[%s247_s6 + $0x10] sm:$0xff]  ;;  %v261_v10 = vld [vmem:[%s247_s6 + $0x8] sm:$0xff]  ;;  %v260_v12 = vld [vmem:[%s247_s6] sm:$0xff] }
  0x12   : > { %546 = vmatpush.msra.mxu2 %v265_v4  ;;  %547 = vmatpush.msra.mxu3 %v265_v4  ;;  %v382_v17 = vld [vmem:[%s761_s3 + $0x18] sm:$0xff]  ;;  %v416_v19 = vld [vmem:[%s762_s4 + $0x8] sm:$0xff]  ;;  %v415_v21 = vld [vmem:[%s762_s4] sm:$0xff] }
  0x13   : > { %314 = vmatpush.msra.mxu0 %v264_v6  ;;  %548 = vmatpush.msra.mxu1 %v264_v6  ;;  %v418_v22 = vld [vmem:[%s762_s4 + $0x18] sm:$0xff] }
  0x14   : > { %549 = vmatpush.msra.mxu2 %v264_v6  ;;  %550 = vmatpush.msra.mxu3 %v264_v6 }
  0x15   : > { %315 = vmatpush.msra.mxu0 %v263_v7  ;;  %551 = vmatpush.msra.mxu1 %v263_v7 }
  0x16   : > { %277 = vperm.xlu0 %589, %v267_v5   ;;  %552 = vmatpush.msra.mxu2 %v263_v7 }
  0x17   : > { %553 = vmatpush.msra.mxu3 %v263_v7  ;;  %287 = vperm.xlu1 %590, %v269_v8  }
  0x18   : > { %316 = vmatpush.msra.mxu0 %v262_v9  ;;  %554 = vmatpush.msra.mxu1 %v262_v9 }
  0x19   : > { %555 = vmatpush.msra.mxu2 %v262_v9  ;;  %556 = vmatpush.msra.mxu3 %v262_v9 }
  0x1a   : > { %317 = vmatpush.msra.mxu0 %v261_v10  ;;  %557 = vmatpush.msra.mxu1 %v261_v10 }
  0x1b   : > { %558 = vmatpush.msra.mxu2 %v261_v10  ;;  %559 = vmatpush.msra.mxu3 %v261_v10 }
  0x1c   : > { %318 = vmatpush.msra.mxu0 %v260_v12  ;;  %560 = vmatpush.msra.mxu1 %v260_v12 }
  0x1d   : > { %561 = vmatpush.msra.mxu2 %v260_v12  ;;  %562 = vmatpush.msra.mxu3 %v260_v12 }
  0x1e   : > { %395 = vperm.xlu0 %589, %v381_v11   ;;  %538 = vmatmul.msk.f32.vlgmr.msra.gmra.mxu0 %vm290_vm0, %v256_v13 }
  0x1f   : > { %539 = vmatmul.msk.f32.vlgmr.msra.gmra.mxu1 %vm290_vm0, %v257_v14  ;;  %540 = vmatmul.msk.f32.vlgmr.msra.gmra.mxu2 %vm290_vm0, %v258_v15 }
  0x20   : > { %541 = vmatmul.msk.f32.vlgmr.msra.gmra.mxu3 %vm290_vm0, %v259_v16  ;;  %400 = vperm.xlu1 %590, %v382_v17  }
  0x21   : > { %390 = vperm.xlu2 %591, %v380_v18  }
  0x26   : > { %426 = vperm.xlu0 %589, %v416_v19  }
  0x28   : > { %431 = vperm.xlu1 %590, %v417_v20  }
  0x29   : > { %421 = vperm.xlu2 %591, %v415_v21  }
  0x31   : > { %436 = vperm.xlu2 %591, %v418_v22  }
  0x6a   : > { %v386_v3 = vpop.permute.xlu2 %385 }
  0x7b   : > { %v391_v8 = vpop.permute.xlu2 %390 }
  0x80   : > { %v273_v23 = vpop.permute.xlu0 %272  ;;  %v283_v24 = vpop.permute.xlu1 %282 }
  0x83   : > { %v422_v15 = vpop.permute.xlu2 %421 }
  0x88   : > { %v278_v26 = vpop.permute.xlu0 %277 }
  0x89   : > { %v288_v35 = vpop.permute.xlu1 %287 }
  0x90   : > { %v396_v12 = vpop.permute.xlu0 %395 }
  0x92   : > { %v401_v13 = vpop.permute.xlu1 %400 }
  0x9b   : > { %v320_v25 = vpop.f32.mrf.mxu0 }
  0x9c   : > { %v721_v27 = vadd.f32 %v320_v25, %v273_v23  ;;  %v323_v28 = vpop.f32.mrf.mxu1 }
  0x9d   : > { %v723_v29 = vadd.f32 %v323_v28, %v278_v26 }
  0x9e   : > { %v347_v30 = vmul.f32 %v721_v27, %v721_v27  ;;  %v333_v32 = vsel %vm332_vm1, %v721_v27, 0.0 }
  0x9f   : > { %v348_v31 = vmul.f32 %v723_v29, %v723_v29  ;;  %v334_v33 = vsel %vm332_vm1, %v723_v29, 0.0 }
  0xa0   : > { %v351_v36 = vsel %vm332_vm1, %v347_v30, 0.0  ;;  %v335_v40 = vadd.f32 %v334_v33, %v333_v32  ;;  %v427_v33 = vpop.permute.xlu0 %426 }
  0xa1   : > { %v352_v37 = vsel %vm332_vm1, %v348_v31, 0.0 }
  0xa2   : > { %v326_v34 = vpop.f32.mrf.mxu2  ;;  %v353_v44 = vadd.f32 %v352_v37, %v351_v36 }
  0xa3   : > { %v327_v38 = vadd.f32 %v326_v34, %v283_v24  ;;  %v329_v39 = vpop.f32.mrf.mxu3  ;;  %v432_v34 = vpop.permute.xlu1 %431 }
  0xa4   : > { %v330_v41 = vadd.f32 %v329_v39, %v288_v35 }
  0xa5   : > { %v336_v42 = vsel %vm332_vm1, %v327_v38, 0.0  ;;  %v349_v43 = vmul.f32 %v327_v38, %v327_v38 }
  0xa6   : > { %v337_v45 = vadd.f32 %v336_v42, %v335_v40  ;;  %v350_v46 = vmul.f32 %v330_v41, %v330_v41  ;;  %v338_v48 = vsel %vm332_vm1, %v330_v41, 0.0 }
  0xa7   : > { %v354_v47 = vsel %vm332_vm1, %v349_v43, 0.0 }
  0xa8   : > { %v355_v49 = vadd.f32 %v354_v47, %v353_v44  ;;  %v339_v50 = vadd.f32 %v338_v48, %v337_v45  ;;  %v356_v51 = vsel %vm332_vm1, %v350_v46, 0.0 }
  0xaa   : > { %v340_v52 = vrot.slane %v339_v50, 4  ;;  %v357_v53 = vadd.f32 %v356_v51, %v355_v49 }
  0xac   : > { %v341_v54 = vadd.f32 %v340_v52, %v339_v50  ;;  %v358_v55 = vrot.slane %v357_v53, 4 }
  0xae   : > { %v342_v56 = vrot.slane %v341_v54, 2  ;;  %v359_v57 = vadd.f32 %v358_v55, %v357_v53 }
  0xb0   : > { %v343_v58 = vadd.f32 %v342_v56, %v341_v54  ;;  %v360_v59 = vrot.slane %v359_v57, 2 }
  0xb2   : > { %v344_v60 = vrot.slane %v343_v58, 1  ;;  %v361_v61 = vadd.f32 %v360_v59, %v359_v57 }
  0xb4   : > { %v345_v62 = vadd.f32 %v344_v60, %v343_v58  ;;  %v362_v63 = vrot.slane %v361_v61, 1 }
  0xb6   : > { %v346_v0 = vmul.f32 0.03125, %v345_v62  ;;  %v363_v1 = vadd.f32 %v362_v63, %v361_v61 }
  0xb8   : > { %v364_v2 = vmul.f32 0.03125, %v363_v1  ;;  %v365_v4 = vmul.f32 %v346_v0, %v346_v0  ;;  %v409_v18 = vsub.f32 %v327_v38, %v346_v0  ;;  %v408_v20 = vsub.f32 %v723_v29, %v346_v0 }
  0xb9   : > { %v407_v21 = vsub.f32 %v721_v27, %v346_v0  ;;  %v410_v22 = vsub.f32 %v330_v41, %v346_v0  ;;  %v437_v27 = vpop.permute.xlu2 %436 }
  0xba   : > { %v366_v5 = vsub.f32 %v364_v2, %v365_v4 }
  0xbc   : > { %v367_v6 = vmax.f32 %v366_v5, 0.0 }
  0xbe   : > { %v368_v7 = vadd.f32 1e-06, %v367_v6 }
  0xc0   : > { %592 = vrsqrt.f32 %v368_v7  ;;  %vm375_vm3 = vweird.f32 %v368_v7 }
  0xc6   : > { %v593_v9 = vpop.eup %592 }
  0xc7   : > { %v370_v10 = vmul.f32 %v593_v9, %v368_v7  ;;  %vm376_vm2 = vweird.f32 %v593_v9 }
  0xc8   : > { %vm377_vm4 = vmor %vm375_vm3, %vm376_vm2 }
  0xc9   : > { %v371_v11 = vmul.f32 %v593_v9, %v370_v10 }
  0xcb   : > { %v372_v14 = vmul.f32 0.5, %v371_v11 }
  0xcd   : > { %v373_v16 = vsub.f32 1.5, %v372_v14 }
  0xcf   : > { %v374_v17 = vmul.f32 %v593_v9, %v373_v16 }
  0xd1   : > { %v378_v19 = vsel %vm377_vm4, %v593_v9, %v374_v17 }
  0xd2   : > { %v403_v23 = vmul.f32 %v386_v3, %v378_v19  ;;  %v405_v24 = vmul.f32 %v396_v12, %v378_v19  ;;  %v404_v25 = vmul.f32 %v391_v8, %v378_v19  ;;  %v406_v26 = vmul.f32 %v401_v13, %v378_v19 }
  0xd4   : > { %v413_v28 = vmul.f32 %v409_v18, %v405_v24  ;;  %v412_v30 = vmul.f32 %v408_v20, %v404_v25  ;;  %v411_v31 = vmul.f32 %v407_v21, %v403_v23  ;;  %v414_v32 = vmul.f32 %v410_v22, %v406_v26 }
  0xd6   : > { %v441_v35 = vadd.f32 %v432_v34, %v413_v28  ;;  %v440_v29 = vadd.f32 %v427_v33, %v412_v30  ;;  %v439_v36 = vadd.f32 %v422_v15, %v411_v31  ;;  %v442_v37 = vadd.f32 %v437_v27, %v414_v32 }
  0xd8   : > { %444 = vst.msk [vmem:[%s255_s15 + $0x8] sm:$0xff] %vm332_vm1, %v440_v29 }
  0xd9   : > { %445 = vst.msk [vmem:[%s255_s15 + $0x10] sm:$0xff] %vm332_vm1, %v441_v35 }
  0xda   : > { %443 = vst.msk [vmem:[%s255_s15] sm:$0xff] %vm332_vm1, %v439_v36 }
  0xdb   : > { %446 = vst.msk [vmem:[%s255_s15 + $0x18] sm:$0xff] %vm332_vm1, %v442_v37 }
  0xdc PF: > { %s15_s20 = sadd.s32 1, %s616_s20   ;;  %s764_s18 = smov %s612_s19 }
  0xdd   : > { %p12_p5 = scmp.ge.s32.totalorder %s15_s20, 4   ;;  %s765_s19 = smov %s767_s21 }
  0xdf   :  { %14 = sbr.rel (!%p12_p5) target bundleno = 2 (0x2), region = 70 }

</bundles_post_ra>
